<compile_context>
chip_gen: v7x
topology: tpu7x:2x2x1
jax: 0.10.0
libtpu: 0.0.40
codegen_flags: <defaults>
</compile_context>

<pallas_src>
import functools

import jax
import jax.numpy as jnp
from jax.experimental import pallas as pl
from jax.experimental.pallas import tpu as pltpu


# ----------------------------------------------------------------------------
# Fused DoubleConv kernel (single invocation, everything VMEM-resident).
# ----------------------------------------------------------------------------
def _double_conv_kernel(p_ref, w1_ref, w2_ref, bn_ref, msk_ref, o_ref,
                        *, n, ho, wo, ho2, wo2):
    # p_ref  : (9*Cin, Mp)   im2col of the input; (tap, cin) on sublanes,
    #                        flattened spatial m = n*Ho*Wo + oh*Wo + ow on
    #                        lanes, zero-padded to Mp (multiple of 128).
    # w1_ref : (Cout, 9*Cin)
    # w2_ref : (Cout, 9*Cout)
    # bn_ref : (Cout, 4)     columns = gamma1, beta1, gamma2, beta2
    # msk_ref: (2, Mp)       row 0 = conv1-valid lanes, row 1 = conv2-valid
    # o_ref  : (Cout, Mp)    conv2 output in the conv1 m-layout (lane-dense);
    #                        valid-lane extraction happens in the wrapper.
    eps = 1e-5
    mp = p_ref.shape[-1]
    m1 = n * ho * wo          # conv1-valid lane count  (BN1 population)
    m2 = n * ho2 * wo2        # conv2-valid lane count  (BN2 population)

    mask1 = msk_ref[0:1, :]   # (1, Mp)
    mask2 = msk_ref[1:2, :]   # (1, Mp)

    def bn_relu(y, gamma, beta, mask, cnt):
        # PyTorch train-mode BatchNorm (biased variance, eps=1e-5) + ReLU.
        # Two-pass mean/variance; statistics only over mask-valid lanes.
        ym = y * mask
        mean = jnp.sum(ym, axis=-1, keepdims=True) * (1.0 / cnt)      # (C,1)
        d = (y - mean) * mask
        var = jnp.sum(d * d, axis=-1, keepdims=True) * (1.0 / cnt)    # (C,1)
        scale = jax.lax.rsqrt(var + eps) * gamma
        return jnp.maximum((y - mean) * scale + beta, 0.0)

    # ---- conv1: single MXU matmul, activations lane-dense (Cout, Mp) -------
    y1 = jnp.dot(w1_ref[...], p_ref[...], preferred_element_type=jnp.float32)
    h1 = bn_relu(y1, bn_ref[:, 0:1], bn_ref[:, 1:2], mask1, float(m1))

    # ---- conv2: the 9 taps are lane-rolls of h1 (tap (kh,kw) reads position
    #      m + kh*Wo + kw).  Valid conv2 lanes never read wrapped / padded /
    #      cross-sample lanes (checked structurally: max valid m + 2*Wo + 2
    #      stays inside the same sample), so no extra masking of taps needed.
    taps = []
    for kh in range(3):
        for kw in range(3):
            s = kh * wo + kw
            taps.append(h1 if s == 0
                        else pltpu.roll(h1, shift=(mp - s) % mp, axis=1))
    stacked = jnp.concatenate(taps, axis=0)                     # (9*Cout, Mp)
    y2 = jnp.dot(w2_ref[...], stacked, preferred_element_type=jnp.float32)
    out = bn_relu(y2, bn_ref[:, 2:3], bn_ref[:, 3:4], mask2, float(m2))

    o_ref[...] = out.astype(o_ref.dtype)                        # unmasked vst


# ----------------------------------------------------------------------------
# DoubleConv forward (NCHW in / NCHW out, matching the PyTorch module).
# ----------------------------------------------------------------------------
@jax.jit
def double_conv(x_nchw, params):
    w1, b1, g1, be1, w2, b2, g2, be2 = params
    n, cin, h, w = x_nchw.shape
    cout = w1.shape[0]
    ho, wo = h - 2, w - 2
    ho2, wo2 = ho - 2, wo - 2
    m1 = n * ho * wo
    mp = ((m1 + 127) // 128) * 128            # lane-pad to a multiple of 128

    # ---- layout plumbing (cheap XLA ops, outside the kernel) ---------------
    # im2col for conv1, transposed: rows = (tap, cin), cols = flattened (n,oh,ow)
    taps = [x_nchw[:, :, kh:kh + ho, kw:kw + wo]       # (N, Cin, Ho, Wo)
            for kh in range(3) for kw in range(3)]
    p = jnp.stack(taps, axis=0)                        # (9, N, Cin, Ho, Wo)
    p = jnp.transpose(p, (0, 2, 1, 3, 4)).reshape(9 * cin, m1)
    p = jnp.pad(p, ((0, 0), (0, mp - m1)))             # (9*Cin, Mp)

    # weights OIHW -> (Cout, 9*Cin) with column index (kh*3+kw)*Cin + ci
    w1_mat = jnp.transpose(w1, (0, 2, 3, 1)).reshape(cout, 9 * cin)
    w2_mat = jnp.transpose(w2, (0, 2, 3, 1)).reshape(cout, 9 * cout)

    # Conv biases are per-channel constants, cancelled exactly by the
    # train-mode BatchNorm mean subtraction that follows each conv.
    del b1, b2

    # BatchNorm params packed into a single (Cout, 4) block.
    bn = jnp.stack([g1, be1, g2, be2], axis=1)         # (Cout, 4)

    # Lane-validity masks (built host-side, no in-kernel integer div/mod).
    lane = jnp.arange(mp)
    within = lane % (ho * wo)
    row = within // wo
    col = within % wo
    valid1 = lane < m1
    valid2 = valid1 & (row < ho2) & (col < wo2)
    masks = jnp.stack([valid1, valid2], axis=0).astype(jnp.float32)  # (2, Mp)

    cost = pl.CostEstimate(
        flops=2 * m1 * (9 * cin) * cout + 2 * m1 * (9 * cout) * cout,
        transcendentals=2 * cout,
        bytes_accessed=4 * (9 * cin * mp + cout * 9 * cin + cout * 9 * cout
                            + 4 * cout + 2 * mp + cout * mp),
    )

    kernel = functools.partial(_double_conv_kernel,
                               n=n, ho=ho, wo=wo, ho2=ho2, wo2=wo2)

    out_full = pl.pallas_call(
        kernel,
        out_shape=jax.ShapeDtypeStruct((cout, mp), jnp.float32),
        in_specs=[pl.BlockSpec(memory_space=pltpu.MemorySpace.VMEM)] * 5,
        out_specs=pl.BlockSpec(memory_space=pltpu.MemorySpace.VMEM),
        cost_estimate=cost,
    )(p, w1_mat, w2_mat, bn, masks)

    # Extract valid conv2 positions and go back to NCHW (wrapper plumbing).
    out = out_full[:, :m1].reshape(cout, n, ho, wo)[:, :, :ho2, :wo2]
    return jnp.transpose(out, (1, 0, 2, 3))            # (N, Cout, Ho2, Wo2)


# ----------------------------------------------------------------------------
# Pure-JAX reference (keeps the conv bias; used for numerical sanity check).
# ----------------------------------------------------------------------------
def reference(x_nchw, params):
    w1, b1, g1, be1, w2, b2, g2, be2 = params

    def conv(x, wgt, b):
        y = jax.lax.conv_general_dilated(
            x, wgt, window_strides=(1, 1), padding="VALID",
            dimension_numbers=("NCHW", "OIHW", "NCHW"))
        return y + b.reshape(1, -1, 1, 1)

    def bnr(y, g, be):
        mean = jnp.mean(y, axis=(0, 2, 3), keepdims=True)
        var = jnp.mean((y - mean) ** 2, axis=(0, 2, 3), keepdims=True)
        out = (y - mean) / jnp.sqrt(var + 1e-5)
        out = out * g.reshape(1, -1, 1, 1) + be.reshape(1, -1, 1, 1)
        return jnp.maximum(out, 0.0)

    y = bnr(conv(x_nchw, w1, b1), g1, be1)
    y = bnr(conv(y, w2, b2), g2, be2)
    return y


if __name__ == "__main__":
    in_channels, out_channels = 4, 8
    N, H, W = 2, 16, 16

    key = jax.random.PRNGKey(0)
    ks = jax.random.split(key, 9)
    # Conv weights in PyTorch OIHW layout, deterministic synthetic init.
    w1 = 0.1 * jax.random.normal(ks[0], (out_channels, in_channels, 3, 3), jnp.float32)
    b1 = 0.1 * jax.random.normal(ks[1], (out_channels,), jnp.float32)
    g1 = 1.0 + 0.1 * jax.random.normal(ks[2], (out_channels,), jnp.float32)
    be1 = 0.1 * jax.random.normal(ks[3], (out_channels,), jnp.float32)
    w2 = 0.1 * jax.random.normal(ks[4], (out_channels, out_channels, 3, 3), jnp.float32)
    b2 = 0.1 * jax.random.normal(ks[5], (out_channels,), jnp.float32)
    g2 = 1.0 + 0.1 * jax.random.normal(ks[6], (out_channels,), jnp.float32)
    be2 = 0.1 * jax.random.normal(ks[7], (out_channels,), jnp.float32)
    params = (w1, b1, g1, be1, w2, b2, g2, be2)

    x = jax.random.normal(ks[8], (N, in_channels, H, W), jnp.float32)

    out = jax.block_until_ready(double_conv(x, params))
    ref = jax.block_until_ready(reference(x, params))

    assert out.shape == (N, out_channels, H - 4, W - 4), out.shape
    assert jnp.allclose(out, ref, atol=1e-3, rtol=1e-3), \
        float(jnp.max(jnp.abs(out - ref)))

    print("KERNEL_OK")
</pallas_src>

<mosaic_0001>
module attributes {stable_mosaic.version = 11 : i64} {
  func.func @_double_conv_kernel(%arg0: memref<36x512xf32, #tpu.memory_space<vmem>>, %arg1: memref<8x36xf32, #tpu.memory_space<vmem>>, %arg2: memref<8x72xf32, #tpu.memory_space<vmem>>, %arg3: memref<8x4xf32, #tpu.memory_space<vmem>>, %arg4: memref<2x512xf32, #tpu.memory_space<vmem>>, %arg5: memref<8x512xf32, #tpu.memory_space<vmem>>) attributes {dimension_semantics = [], scalar_prefetch = 0 : i64, scratch_operands = 0 : i64, tpu.core_type = #tpu.core_type<tc>} {
    %c0 = arith.constant 0 : index
    %c0_0 = arith.constant 0 : index
    %0 = vector.load %arg4[%c0, %c0_0] : memref<2x512xf32, #tpu.memory_space<vmem>>, vector<1x512xf32>
    %c1 = arith.constant 1 : index
    %c0_1 = arith.constant 0 : index
    %1 = vector.load %arg4[%c1, %c0_1] : memref<2x512xf32, #tpu.memory_space<vmem>>, vector<1x512xf32>
    %c0_2 = arith.constant 0 : index
    %c0_3 = arith.constant 0 : index
    %2 = vector.load %arg1[%c0_2, %c0_3] : memref<8x36xf32, #tpu.memory_space<vmem>>, vector<8x36xf32>
    %c0_4 = arith.constant 0 : index
    %c0_5 = arith.constant 0 : index
    %3 = vector.load %arg0[%c0_4, %c0_5] : memref<36x512xf32, #tpu.memory_space<vmem>>, vector<36x512xf32>
    %cst = arith.constant dense<0.000000e+00> : vector<8x512xf32>
    %4 = tpu.matmul %2, %3, %cst {dimension_numbers = #tpu.dot_dimension_numbers<[1], [0], [0], [1], [0, 0, 1, 1], [], []>} : vector<8x36xf32>, vector<36x512xf32>, vector<8x512xf32> -> vector<8x512xf32>
    %c0_6 = arith.constant 0 : index
    %c0_7 = arith.constant 0 : index
    %5 = vector.load %arg3[%c0_6, %c0_7] : memref<8x4xf32, #tpu.memory_space<vmem>>, vector<8x1xf32>
    %c0_8 = arith.constant 0 : index
    %c1_9 = arith.constant 1 : index
    %6 = vector.load %arg3[%c0_8, %c1_9] : memref<8x4xf32, #tpu.memory_space<vmem>>, vector<8x1xf32>
    %7 = vector.broadcast %0 : vector<1x512xf32> to vector<8x512xf32>
    %8 = arith.mulf %4, %7 : vector<8x512xf32>
    %cst_10 = arith.constant dense<0.000000e+00> : vector<8xf32>
    %9 = vector.multi_reduction <add>, %8, %cst_10 [1] : vector<8x512xf32> to vector<8xf32>
    %10 = vector.shape_cast %9 : vector<8xf32> to vector<8x1xf32>
    %cst_11 = arith.constant 0.00255102036 : f32
    %11 = vector.broadcast %cst_11 : f32 to vector<8x1xf32>
    %12 = arith.mulf %10, %11 : vector<8x1xf32>
    %13 = vector.broadcast %12 : vector<8x1xf32> to vector<8x512xf32>
    %14 = arith.subf %4, %13 : vector<8x512xf32>
    %15 = vector.broadcast %0 : vector<1x512xf32> to vector<8x512xf32>
    %16 = arith.mulf %14, %15 : vector<8x512xf32>
    %17 = arith.mulf %16, %16 : vector<8x512xf32>
    %cst_12 = arith.constant dense<0.000000e+00> : vector<8xf32>
    %18 = vector.multi_reduction <add>, %17, %cst_12 [1] : vector<8x512xf32> to vector<8xf32>
    %19 = vector.shape_cast %18 : vector<8xf32> to vector<8x1xf32>
    %cst_13 = arith.constant 0.00255102036 : f32
    %20 = vector.broadcast %cst_13 : f32 to vector<8x1xf32>
    %21 = arith.mulf %19, %20 : vector<8x1xf32>
    %cst_14 = arith.constant 9.99999974E-6 : f32
    %22 = vector.broadcast %cst_14 : f32 to vector<8x1xf32>
    %23 = arith.addf %21, %22 : vector<8x1xf32>
    %24 = math.rsqrt %23 : vector<8x1xf32>
    %25 = arith.mulf %24, %5 : vector<8x1xf32>
    %26 = vector.broadcast %12 : vector<8x1xf32> to vector<8x512xf32>
    %27 = arith.subf %4, %26 : vector<8x512xf32>
    %28 = vector.broadcast %25 : vector<8x1xf32> to vector<8x512xf32>
    %29 = arith.mulf %27, %28 : vector<8x512xf32>
    %30 = vector.broadcast %6 : vector<8x1xf32> to vector<8x512xf32>
    %31 = arith.addf %29, %30 : vector<8x512xf32>
    %cst_15 = arith.constant 0.000000e+00 : f32
    %32 = vector.broadcast %cst_15 : f32 to vector<8x512xf32>
    %33 = arith.maximumf %31, %32 : vector<8x512xf32>
    %c511_i32 = arith.constant 511 : i32
    %34 = tpu.dynamic_rotate %33 by %c511_i32 dim 1 : vector<8x512xf32>, i32 -> vector<8x512xf32>
    %c510_i32 = arith.constant 510 : i32
    %35 = tpu.dynamic_rotate %33 by %c510_i32 dim 1 : vector<8x512xf32>, i32 -> vector<8x512xf32>
    %c498_i32 = arith.constant 498 : i32
    %36 = tpu.dynamic_rotate %33 by %c498_i32 dim 1 : vector<8x512xf32>, i32 -> vector<8x512xf32>
    %c497_i32 = arith.constant 497 : i32
    %37 = tpu.dynamic_rotate %33 by %c497_i32 dim 1 : vector<8x512xf32>, i32 -> vector<8x512xf32>
    %c496_i32 = arith.constant 496 : i32
    %38 = tpu.dynamic_rotate %33 by %c496_i32 dim 1 : vector<8x512xf32>, i32 -> vector<8x512xf32>
    %c484_i32 = arith.constant 484 : i32
    %39 = tpu.dynamic_rotate %33 by %c484_i32 dim 1 : vector<8x512xf32>, i32 -> vector<8x512xf32>
    %c483_i32 = arith.constant 483 : i32
    %40 = tpu.dynamic_rotate %33 by %c483_i32 dim 1 : vector<8x512xf32>, i32 -> vector<8x512xf32>
    %c482_i32 = arith.constant 482 : i32
    %41 = tpu.dynamic_rotate %33 by %c482_i32 dim 1 : vector<8x512xf32>, i32 -> vector<8x512xf32>
    %42 = tpu.concatenate %33, %34, %35, %36, %37, %38, %39, %40, %41 in 0 : vector<8x512xf32>, vector<8x512xf32>, vector<8x512xf32>, vector<8x512xf32>, vector<8x512xf32>, vector<8x512xf32>, vector<8x512xf32>, vector<8x512xf32>, vector<8x512xf32> -> vector<72x512xf32>
    %c0_16 = arith.constant 0 : index
    %c0_17 = arith.constant 0 : index
    %43 = vector.load %arg2[%c0_16, %c0_17] : memref<8x72xf32, #tpu.memory_space<vmem>>, vector<8x72xf32>
    %cst_18 = arith.constant dense<0.000000e+00> : vector<8x512xf32>
    %44 = tpu.matmul %43, %42, %cst_18 {dimension_numbers = #tpu.dot_dimension_numbers<[1], [0], [0], [1], [0, 0, 1, 1], [], []>} : vector<8x72xf32>, vector<72x512xf32>, vector<8x512xf32> -> vector<8x512xf32>
    %c0_19 = arith.constant 0 : index
    %c2 = arith.constant 2 : index
    %45 = vector.load %arg3[%c0_19, %c2] : memref<8x4xf32, #tpu.memory_space<vmem>>, vector<8x1xf32>
    %c0_20 = arith.constant 0 : index
    %c3 = arith.constant 3 : index
    %46 = vector.load %arg3[%c0_20, %c3] : memref<8x4xf32, #tpu.memory_space<vmem>>, vector<8x1xf32>
    %47 = vector.broadcast %1 : vector<1x512xf32> to vector<8x512xf32>
    %48 = arith.mulf %44, %47 : vector<8x512xf32>
    %cst_21 = arith.constant dense<0.000000e+00> : vector<8xf32>
    %49 = vector.multi_reduction <add>, %48, %cst_21 [1] : vector<8x512xf32> to vector<8xf32>
    %50 = vector.shape_cast %49 : vector<8xf32> to vector<8x1xf32>
    %cst_22 = arith.constant 0.00347222225 : f32
    %51 = vector.broadcast %cst_22 : f32 to vector<8x1xf32>
    %52 = arith.mulf %50, %51 : vector<8x1xf32>
    %53 = vector.broadcast %52 : vector<8x1xf32> to vector<8x512xf32>
    %54 = arith.subf %44, %53 : vector<8x512xf32>
    %55 = vector.broadcast %1 : vector<1x512xf32> to vector<8x512xf32>
    %56 = arith.mulf %54, %55 : vector<8x512xf32>
    %57 = arith.mulf %56, %56 : vector<8x512xf32>
    %cst_23 = arith.constant dense<0.000000e+00> : vector<8xf32>
    %58 = vector.multi_reduction <add>, %57, %cst_23 [1] : vector<8x512xf32> to vector<8xf32>
    %59 = vector.shape_cast %58 : vector<8xf32> to vector<8x1xf32>
    %cst_24 = arith.constant 0.00347222225 : f32
    %60 = vector.broadcast %cst_24 : f32 to vector<8x1xf32>
    %61 = arith.mulf %59, %60 : vector<8x1xf32>
    %cst_25 = arith.constant 9.99999974E-6 : f32
    %62 = vector.broadcast %cst_25 : f32 to vector<8x1xf32>
    %63 = arith.addf %61, %62 : vector<8x1xf32>
    %64 = math.rsqrt %63 : vector<8x1xf32>
    %65 = arith.mulf %64, %45 : vector<8x1xf32>
    %66 = vector.broadcast %52 : vector<8x1xf32> to vector<8x512xf32>
    %67 = arith.subf %44, %66 : vector<8x512xf32>
    %68 = vector.broadcast %65 : vector<8x1xf32> to vector<8x512xf32>
    %69 = arith.mulf %67, %68 : vector<8x512xf32>
    %70 = vector.broadcast %46 : vector<8x1xf32> to vector<8x512xf32>
    %71 = arith.addf %69, %70 : vector<8x512xf32>
    %cst_26 = arith.constant 0.000000e+00 : f32
    %72 = vector.broadcast %cst_26 : f32 to vector<8x512xf32>
    %73 = arith.maximumf %71, %72 : vector<8x512xf32>
    %c0_27 = arith.constant 0 : index
    %c0_28 = arith.constant 0 : index
    %74 = vector.load %arg5[%c0_27, %c0_28] : memref<8x512xf32, #tpu.memory_space<vmem>>, vector<8x512xf32>
    tpu.vector_store %arg5[%c0_27, %c0_28], %73 {strides = array<i32>} : memref<8x512xf32, #tpu.memory_space<vmem>>, vector<8x512xf32>,
    return
  }
}

</mosaic_0001>

<bundles_post_ra>
// kernel: double_conv.1
= control target key start
LH: loop header
LB: loop body
LE: loop exit
PB: predicated region body
PF: predicated region fallthrough
CT: control target
= control target key end

     0   :  { %v761_v3 = vmov 0.0   ;;  %vm48_vm0 = vcmask 1043456   ;;  %vm44_vm1 = vcmask 293888   ;;  %v205_v30 = vlaneseq  ;;  %s765_s12 = smov 112   ;;  %s766_s13 = smov 126   ;;  %s987_s0 = inlined_call_operand.vmem [shape: f32[36,512], index: 0, kind: input, shape index: {}]   ;;  %s988_s1 = inlined_call_operand.vmem [shape: f32[8,36], index: 1, kind: input, shape index: {}]   ;;  %s989_s4 = inlined_call_operand.vmem [shape: f32[2,512], index: 4, kind: input, shape index: {}]   ;;  %s990_s3 = inlined_call_operand.vmem [shape: f32[8,4], index: 3, kind: input, shape index: {}]   ;;  %s991_s2 = inlined_call_operand.vmem [shape: f32[8,72], index: 2, kind: input, shape index: {}]   ;;  %s992_s5 = inlined_call_operand.vmem [shape: f32[8,512], index: 5, kind: output, shape index: {}]  }
   0x1   :  { %v25_v0 = vld [vmem:[%s987_s0 + $0x8] sm:$0xff]  ;;  %v24_v2 = vld [vmem:[%s987_s0] sm:$0xff]  ;;  %125 = vmatprep.mubr.f32.mxu0 %v761_v3  ;;  %196 = vmatprep.mubr.f32.mxu1 %v761_v3  ;;  %v27_v6 = vld [vmem:[%s987_s0 + $0x18] sm:$0xff]  ;;  %s767_s14 = smov 114   ;;  %s768_s15 = smov 99   ;;  %vm385_vm10 = vcmask 588800  }
   0x2   :  { %v29_v1 = vld [vmem:[%s987_s0 + $0x28] sm:$0xff]  ;;  %v28_v5 = vld [vmem:[%s987_s0 + $0x20] sm:$0xff]  ;;  %v31_v7 = vld [vmem:[%s987_s0 + $0x38] sm:$0xff]  ;;  %v868_v31 = vshrl.u32 %v205_v30, 7  ;;  %s769_s16 = smov 98   ;;  %s770_s17 = smov 113  }
   0x3   :  { %v621_v4 = vpack.c.bf16 %v29_v1, %v25_v0  ;;  %v623_v8 = vpack.c.bf16 %v28_v5, %v24_v2  ;;  %v629_v9 = vpack.c.bf16 %v31_v7, %v27_v6  ;;  %v26_v10 = vld [vmem:[%s987_s0 + $0x10] sm:$0xff]  ;;  %v33_v12 = vld [vmem:[%s987_s0 + $0x48] sm:$0xff]  ;;  %v32_v15 = vld [vmem:[%s987_s0 + $0x40] sm:$0xff]  ;;  %v762_v5 = vmov 0   ;;  %s771_s18 = smov 100  }
   0x4   :  { %v30_v11 = vld [vmem:[%s987_s0 + $0x30] sm:$0xff]  ;;  %v37_v14 = vld [vmem:[%s987_s0 + $0x68] sm:$0xff]  ;;  %v36_v16 = vld [vmem:[%s987_s0 + $0x60] sm:$0xff]  ;;  %v207_v32 = vsub.s32 0, %v868_v31  ;;  %v211_v34 = vsub.s32 1, %v868_v31  ;;  %v215_v35 = vsub.s32 2, %v868_v31  ;;  %682 = vset.pattern.permute.xlu1 %v762_v5 }
   0x5   :  { %622 = vmatprep.subr.bf16.mxu0 %v621_v4  ;;  %v631_v13 = vpack.c.bf16 %v30_v11, %v26_v10  ;;  %630 = vmatprep.subr.bf16.mxu1 %v629_v9  ;;  %v625_v17 = vpack.c.bf16 %v37_v14, %v33_v12  ;;  %v627_v18 = vpack.c.bf16 %v36_v16, %v32_v15  ;;  %v35_v19 = vld [vmem:[%s987_s0 + $0x58] sm:$0xff]  ;;  %v34_v21 = vld [vmem:[%s987_s0 + $0x50] sm:$0xff]  ;;  %v41_v25 = vld [vmem:[%s987_s0 + $0x88] sm:$0xf]  ;;  %v219_v39 = vsub.s32 3, %v868_v31 }
   0x6   :  { %624 = vmatpush1.bf16.msra.mxu0 %v623_v8  ;;  %v39_v20 = vld [vmem:[%s987_s0 + $0x78] sm:$0xff]  ;;  %v38_v23 = vld [vmem:[%s987_s0 + $0x70] sm:$0xff]  ;;  %v40_v27 = vld [vmem:[%s987_s0 + $0x80] sm:$0xf]  ;;  %v763_v12 = vmov 1  }
   0x7   :  { %632 = vmatpush1.bf16.msra.mxu1 %v631_v13  ;;  %v633_v22 = vpack.c.bf16 %v39_v20, %v35_v19  ;;  %626 = vmatprep.subr.bf16.mxu0 %v625_v17  ;;  %v635_v24 = vpack.c.bf16 %v38_v23, %v34_v21  ;;  %v43_v26 = vld [vmem:[%s987_s0 + $0x98] sm:$0xf]  ;;  %v23_v28 = vld [vmem:[%s988_s1] sm:$0xff]  ;;  %v42_v29 = vld [vmem:[%s987_s0 + $0x90] sm:$0xf] }
   0x8   :  { %v20_v33 = vld [vmem:[%s989_s4] ss:$2 sm:$0xf] }
   0x9   :  { %634 = vmatprep.subr.bf16.mxu1 %v633_v22  ;;  %v208_v36 = vrot.slane %v20_v33, %v207_v32  ;;  %v212_v37 = vrot.slane %v20_v33, %v211_v34  ;;  %v216_v38 = vrot.slane %v20_v33, %v215_v35  ;;  %v220_v47 = vrot.slane %v20_v33, %v219_v39  ;;  %v888_v9 = vld [vmem:[%s990_s3] sm:$0xff]  ;;  %s764_s3 = smov 127  }
   0xa   :  { %628 = vmatpush1.bf16.msra.mxu0 %v627_v18 }
   0xb   :  { %636 = vmatpush1.bf16.msra.mxu1 %v635_v24  ;;  %613 = vmatprep.subr.msk.mxu0 %vm48_vm0, %v41_v25 }
   0xc   :  { %616 = vmatprep.subr.msk.mxu1 %vm48_vm0, %v43_v26 }
   0xe   :  { %614 = vmatpush1.msk.msra.mxu0 %vm48_vm0, %v40_v27 }
   0xf   :  { %615 = vmatmul.mubr.msk.f32.vlgmr.msra.gmra.mrb[0].mxu0 %vm44_vm1, %v23_v28  ;;  %617 = vmatpush1.msk.msra.mxu1 %vm48_vm0, %v42_v29  ;;  %v893_v29 = vand.u32 127, %v205_v30 }
  0x10   :  { %618 = vmatmul.mubr.msk.f32.vlgmr.msra.gmra.mrb[0].mxu1 %vm44_vm1, %v23_v28  ;;  %453 = vmatprep.mubr.f32.mxu0 %v761_v3 }
  0x11   :  { %524 = vmatprep.mubr.f32.mxu1 %v761_v3  ;;  %vm288_vm2 = vcmp.lt.s32.totalorder %v893_v29, 127  ;;  %vm301_vm3 = vcmp.lt.s32.totalorder %v893_v29, 126  ;;  %vm314_vm4 = vcmp.lt.s32.totalorder %v893_v29, 114  ;;  %vm340_vm5 = vcmp.lt.s32.totalorder %v893_v29, 112 }
  0x12   :  { %vm327_vm6 = vcmp.lt.s32.totalorder %v893_v29, 113  ;;  %vm366_vm7 = vcmp.lt.s32.totalorder %v893_v29, 99  ;;  %vm353_vm8 = vcmp.lt.s32.totalorder %v893_v29, 100  ;;  %vm379_vm9 = vcmp.lt.s32.totalorder %v893_v29, 98 }
  0xe2   :  { %v127_v40 = vpop.f32.mrb[0].mxu0 }
  0xe3   :  { %v225_v41 = vmul.f32 %v208_v36, %v127_v40  ;;  %v129_v42 = vpop.f32.mrb[1].mxu0  ;;  %v198_v43 = vpop.f32.mrb[0].mxu1 }
  0xe4   :  { %v226_v44 = vmul.f32 %v212_v37, %v129_v42  ;;  %v227_v45 = vmul.f32 %v216_v38, %v198_v43  ;;  %v200_v46 = vpop.f32.mrb[1].mxu1 }
  0xe5   :  { %v228_v49 = vmul.f32 %v220_v47, %v200_v46 }
  0xe6   :  { %v229_v48 = vadd.f32 %v226_v44, %v225_v41 }
  0xe8   :  { %v230_v50 = vadd.f32 %v229_v48, %v227_v45 }
  0xea   :  { %v231_v51 = vadd.f32 %v230_v50, %v228_v49 }
  0xec   :  { %232 = vadd.xlane.f32.xlu0 %v231_v51 }
 0x179   :  { %v233_v52 = vpop.xlane.xlu0 %232 }
 0x17a   :  { %v234_v53 = vmul.f32 0.0025510204, %v233_v52 }
 0x17c   :  { %v235_v54 = vsub.f32 %v127_v40, %v234_v53  ;;  %v236_v55 = vsub.f32 %v129_v42, %v234_v53  ;;  %v237_v56 = vsub.f32 %v198_v43, %v234_v53  ;;  %v238_v57 = vsub.f32 %v200_v46, %v234_v53 }
 0x17e   :  { %v239_v58 = vmul.f32 %v235_v54, %v208_v36  ;;  %v240_v59 = vmul.f32 %v236_v55, %v212_v37  ;;  %v241_v60 = vmul.f32 %v237_v56, %v216_v38  ;;  %v242_v61 = vmul.f32 %v238_v57, %v220_v47 }
 0x180   :  { %v243_v62 = vmul.f32 %v239_v58, %v239_v58  ;;  %v244_v63 = vmul.f32 %v240_v59, %v240_v59  ;;  %v245_v0 = vmul.f32 %v241_v60, %v241_v60  ;;  %v246_v2 = vmul.f32 %v242_v61, %v242_v61 }
 0x182   :  { %v247_v1 = vadd.f32 %v244_v63, %v243_v62 }
 0x184   :  { %v248_v3 = vadd.f32 %v247_v1, %v245_v0 }
 0x186   :  { %v249_v4 = vadd.f32 %v248_v3, %v246_v2 }
 0x188   :  { %250 = vadd.xlane.f32.xlu0 %v249_v4 }
 0x215   :  { %v251_v6 = vpop.xlane.xlu0 %250 }
 0x216   :  { %v252_v7 = vmul.f32 0.0025510204, %v251_v6 }
 0x218   :  { %v253_v8 = vadd.f32 1e-05, %v252_v7 }
 0x21a   :  { %757 = vrsqrt.f32 %v253_v8 }
 0x224   :  { %v758_v10 = vpop.eup %757 }
 0x225   :  { %v255_v11 = vmul.f32 %v758_v10, %v888_v9 }
 0x227   :  { %258 = vperm.xlu1 %682, %v255_v11  }
 0x22b   :  { %683 = vset.pattern.permute.xlu1 %v763_v12 }
 0x22c   :  { %267 = vperm.xlu1 %683, %v888_v9  }
 0x2a6   :  { %v259_v13 = vpop.permute.xlu1 %258 }
 0x2a7   :  { %v261_v14 = vmul.f32 %v259_v13, %v235_v54  ;;  %v262_v15 = vmul.f32 %v259_v13, %v236_v55  ;;  %v263_v16 = vmul.f32 %v259_v13, %v237_v56  ;;  %v264_v17 = vmul.f32 %v259_v13, %v238_v57 }
 0x2ab   :  { %v268_v18 = vpop.permute.xlu1 %267 }
 0x2ac   :  { %v270_v19 = vadd.f32 %v268_v18, %v261_v14  ;;  %v271_v20 = vadd.f32 %v268_v18, %v262_v15  ;;  %v272_v21 = vadd.f32 %v268_v18, %v263_v16  ;;  %v273_v22 = vadd.f32 %v268_v18, %v264_v17 }
 0x2ae   :  { %v274_v23 = vmax.f32 %v270_v19, 0.0  ;;  %v275_v24 = vmax.f32 %v271_v20, 0.0  ;;  %v276_v25 = vmax.f32 %v272_v21, 0.0  ;;  %v277_v26 = vmax.f32 %v273_v22, 0.0 }
 0x2b0   :  { %v684_v27 = vpack.i.bf16 %v276_v25, %v275_v24  ;;  %v689_v28 = vpack.i.bf16 %v277_v26, %v274_v23 }
 0x2b2   :  { %685 = vrot.lane.b32.xlu0 %v684_v27, %s764_s3  ;;  %690 = vrot.lane.b32.xlu1 %v689_v28, %s764_s3 }
 0x2b6   :  { %720 = vrot.lane.b32.xlu0 %v684_v27, %s765_s12  ;;  %695 = vrot.lane.b32.xlu1 %v684_v27, %s766_s13 }
 0x2ba   :  { %730 = vrot.lane.b32.xlu0 %v689_v28, %s765_s12  ;;  %700 = vrot.lane.b32.xlu1 %v684_v27, %s767_s14 }
 0x2be   :  { %740 = vrot.lane.b32.xlu0 %v684_v27, %s768_s15  ;;  %705 = vrot.lane.b32.xlu1 %v689_v28, %s766_s13 }
 0x2c2   :  { %750 = vrot.lane.b32.xlu0 %v689_v28, %s768_s15  ;;  %710 = vrot.lane.b32.xlu1 %v689_v28, %s767_s14 }
 0x2c6   :  { %375 = vrot.lane.b32.xlu0 %v276_v25, %s769_s16  ;;  %715 = vrot.lane.b32.xlu1 %v684_v27, %s770_s17 }
 0x2ca   :  { %377 = vrot.lane.b32.xlu0 %v277_v26, %s769_s16  ;;  %725 = vrot.lane.b32.xlu1 %v689_v28, %s770_s17 }
 0x2ce   :  { %735 = vrot.lane.b32.xlu1 %v684_v27, %s771_s18 }
 0x2d2   :  { %745 = vrot.lane.b32.xlu1 %v689_v28, %s771_s18 }
 0x2d6   :  { %373 = vrot.lane.b32.xlu1 %v275_v24, %s769_s16 }
 0x2da   :  { %371 = vrot.lane.b32.xlu1 %v274_v23, %s769_s16 }
 0x324   :  { %v686_v33 = vpop.permute.xlu0 %685  ;;  %v691_v36 = vpop.permute.xlu1 %690 }
 0x325   :  { %v688_v37 = vunpack.i.h.bf16 %v686_v33  ;;  %v687_v38 = vunpack.i.l.bf16 %v686_v33  ;;  %v693_v40 = vunpack.i.h.bf16 %v691_v36  ;;  %v692_v41 = vunpack.i.l.bf16 %v691_v36 }
 0x327   :  { %v289_v42 = vsel %vm288_vm2, %v688_v37, %v693_v40  ;;  %v291_v43 = vsel %vm288_vm2, %v692_v41, %v687_v38  ;;  %v290_v44 = vsel %vm288_vm2, %v687_v38, %v688_v37  ;;  %v292_v45 = vsel %vm288_vm2, %v693_v40, %v692_v41 }
 0x328   :  { %v655_v46 = vpack.c.bf16 %v289_v42, %v276_v25  ;;  %v639_v47 = vpack.c.bf16 %v291_v43, %v274_v23  ;;  %v696_v48 = vpop.permute.xlu1 %695  ;;  %v637_v49 = vpack.c.bf16 %v290_v44, %v275_v24  ;;  %v653_v50 = vpack.c.bf16 %v292_v45, %v277_v26  ;;  %v721_v53 = vpop.permute.xlu0 %720 }
 0x329   :  { %v698_v30 = vunpack.i.h.bf16 %v696_v48  ;;  %v697_v51 = vunpack.i.l.bf16 %v696_v48  ;;  %v723_v2 = vunpack.i.h.bf16 %v721_v53  ;;  %v722_v3 = vunpack.i.l.bf16 %v721_v53 }
 0x32a   :  { %638 = vmatprep.subr.bf16.mxu0 %v637_v49  ;;  %654 = vmatprep.subr.bf16.mxu1 %v653_v50 }
 0x32b   :  { %640 = vmatpush1.bf16.msra.mxu0 %v639_v47  ;;  %656 = vmatpush1.bf16.msra.mxu1 %v655_v46  ;;  %v303_v56 = vsel %vm301_vm3, %v697_v51, %v698_v30  ;;  %v342_v21 = vsel %vm340_vm5, %v722_v3, %v723_v2 }
 0x32c   :  { %v701_v52 = vpop.permute.xlu1 %700  ;;  %v731_v60 = vpop.permute.xlu0 %730 }
 0x32d   :  { %v703_v54 = vunpack.i.h.bf16 %v701_v52  ;;  %v702_v55 = vunpack.i.l.bf16 %v701_v52  ;;  %v733_v18 = vunpack.i.h.bf16 %v731_v60  ;;  %v732_v19 = vunpack.i.l.bf16 %v731_v60 }
 0x32f   :  { %v316_v57 = vsel %vm314_vm4, %v702_v55, %v703_v54  ;;  %v341_v26 = vsel %vm340_vm5, %v723_v2, %v733_v18  ;;  %v343_v27 = vsel %vm340_vm5, %v732_v19, %v722_v3  ;;  %v344_v33 = vsel %vm340_vm5, %v733_v18, %v732_v19 }
 0x330   :  { %v706_v58 = vpop.permute.xlu1 %705  ;;  %v641_v59 = vpack.c.bf16 %v316_v57, %v303_v56  ;;  %v741_v14 = vpop.permute.xlu0 %740 }
 0x331   :  { %v708_v61 = vunpack.i.h.bf16 %v706_v58  ;;  %v707_v62 = vunpack.i.l.bf16 %v706_v58  ;;  %v743_v28 = vunpack.i.h.bf16 %v741_v14  ;;  %v742_v36 = vunpack.i.l.bf16 %v741_v14 }
 0x332   :  { %642 = vmatprep.subr.bf16.mxu0 %v641_v59 }
 0x333   :  { %v302_v4 = vsel %vm301_vm3, %v698_v30, %v708_v61  ;;  %v304_v5 = vsel %vm301_vm3, %v707_v62, %v697_v51  ;;  %v305_v12 = vsel %vm301_vm3, %v708_v61, %v707_v62  ;;  %v368_v30 = vsel %vm366_vm7, %v742_v36, %v743_v28 }
 0x334   :  { %v711_v63 = vpop.permute.xlu1 %710  ;;  %v751_v37 = vpop.permute.xlu0 %750 }
 0x335   :  { %v713_v0 = vunpack.i.h.bf16 %v711_v63  ;;  %v712_v1 = vunpack.i.l.bf16 %v711_v63  ;;  %v753_v48 = vunpack.i.h.bf16 %v751_v37  ;;  %v752_v49 = vunpack.i.l.bf16 %v751_v37 }
 0x337   :  { %v315_v6 = vsel %vm314_vm4, %v703_v54, %v713_v0  ;;  %v317_v7 = vsel %vm314_vm4, %v712_v1, %v702_v55  ;;  %v318_v13 = vsel %vm314_vm4, %v713_v0, %v712_v1  ;;  %v367_v56 = vsel %vm366_vm7, %v743_v28, %v753_v48 }
 0x338   :  { %v643_v8 = vpack.c.bf16 %v317_v7, %v304_v5  ;;  %v659_v10 = vpack.c.bf16 %v315_v6, %v302_v4  ;;  %v716_v11 = vpop.permute.xlu1 %715  ;;  %v657_v17 = vpack.c.bf16 %v318_v13, %v305_v12  ;;  %v376_v53 = vpop.permute.xlu0 %375  ;;  %v369_v57 = vsel %vm366_vm7, %v752_v49, %v742_v36  ;;  %v384_v5 = vld [vmem:[%s991_s2] sm:$0xff] }
 0x339   :  { %v718_v15 = vunpack.i.h.bf16 %v716_v11  ;;  %v717_v16 = vunpack.i.l.bf16 %v716_v11  ;;  %v370_v61 = vsel %vm366_vm7, %v753_v48, %v752_v49 }
 0x33a   :  { %644 = vmatpush1.bf16.msra.mxu0 %v643_v8  ;;  %658 = vmatprep.subr.bf16.mxu1 %v657_v17 }
 0x33b   :  { %v329_v20 = vsel %vm327_vm6, %v717_v16, %v718_v15  ;;  %660 = vmatpush1.bf16.msra.mxu1 %v659_v10  ;;  %v612_v10 = vld [vmem:[%s989_s4 + $0x1] ss:$2 sm:$0xf] }
 0x33c   :  { %v726_v22 = vpop.permute.xlu1 %725  ;;  %v645_v23 = vpack.c.bf16 %v342_v21, %v329_v20  ;;  %v378_v3 = vpop.permute.xlu0 %377  ;;  %v535_v11 = vrot.slane %v612_v10, %v207_v32  ;;  %v539_v12 = vrot.slane %v612_v10, %v211_v34  ;;  %v543_v13 = vrot.slane %v612_v10, %v215_v35 }
 0x33d   :  { %v728_v24 = vunpack.i.h.bf16 %v726_v22  ;;  %v727_v25 = vunpack.i.l.bf16 %v726_v22  ;;  %v380_v8 = vsel %vm379_vm9, %v376_v53, %v378_v3  ;;  %v547_v20 = vrot.slane %v612_v10, %v219_v39 }
 0x33e   :  { %646 = vmatprep.subr.bf16.mxu0 %v645_v23 }
 0x33f   :  { %v328_v38 = vsel %vm327_vm6, %v718_v15, %v728_v24  ;;  %v330_v40 = vsel %vm327_vm6, %v727_v25, %v717_v16  ;;  %v331_v41 = vsel %vm327_vm6, %v728_v24, %v727_v25 }
 0x340   :  { %v647_v42 = vpack.c.bf16 %v343_v27, %v330_v40  ;;  %v663_v43 = vpack.c.bf16 %v341_v26, %v328_v38  ;;  %v736_v44 = vpop.permute.xlu1 %735  ;;  %v661_v45 = vpack.c.bf16 %v344_v33, %v331_v41 }
 0x341   :  { %v738_v46 = vunpack.i.h.bf16 %v736_v44  ;;  %v737_v47 = vunpack.i.l.bf16 %v736_v44  ;;  %v772_v44 = vmov 2  }
 0x342   :  { %648 = vmatpush1.bf16.msra.mxu0 %v647_v42  ;;  %662 = vmatprep.subr.bf16.mxu1 %v661_v45  ;;  %v773_v45 = vmov 3  }
 0x343   :  { %664 = vmatpush1.bf16.msra.mxu1 %v663_v43  ;;  %v355_v50 = vsel %vm353_vm8, %v737_v47, %v738_v46  ;;  %754 = vset.pattern.permute.xlu0 %v772_v44 }
 0x344   :  { %v746_v51 = vpop.permute.xlu1 %745  ;;  %v649_v52 = vpack.c.bf16 %v368_v30, %v355_v50  ;;  %755 = vset.pattern.permute.xlu1 %v773_v45 }
 0x345   :  { %v748_v54 = vunpack.i.h.bf16 %v746_v51  ;;  %v747_v55 = vunpack.i.l.bf16 %v746_v51 }
 0x346   :  { %650 = vmatprep.subr.bf16.mxu0 %v649_v52 }
 0x347   :  { %v354_v58 = vsel %vm353_vm8, %v738_v46, %v748_v54  ;;  %v356_v59 = vsel %vm353_vm8, %v747_v55, %v737_v47  ;;  %v357_v60 = vsel %vm353_vm8, %v748_v54, %v747_v55 }
 0x348   :  { %v651_v62 = vpack.c.bf16 %v369_v57, %v356_v59  ;;  %v667_v63 = vpack.c.bf16 %v367_v56, %v354_v58  ;;  %v374_v0 = vpop.permute.xlu1 %373  ;;  %v665_v1 = vpack.c.bf16 %v370_v61, %v357_v60 }
 0x349   :  { %v381_v2 = vsel %vm379_vm9, %v374_v0, %v376_v53 }
 0x34a   :  { %652 = vmatpush1.bf16.msra.mxu0 %v651_v62  ;;  %666 = vmatprep.subr.bf16.mxu1 %v665_v1 }
 0x34b   :  { %405 = vmatprep.subr.mxu0 %v381_v2  ;;  %668 = vmatpush1.bf16.msra.mxu1 %v667_v63 }
 0x34c   :  { %v372_v4 = vpop.permute.xlu1 %371 }
 0x34d   :  { %v382_v6 = vsel %vm379_vm9, %v372_v4, %v374_v0  ;;  %v383_v7 = vsel %vm379_vm9, %v378_v3, %v372_v4 }
 0x34e   :  { %406 = vmatpush1.msra.mxu0 %v382_v6  ;;  %476 = vmatprep.subr.mxu1 %v383_v7 }
 0x34f   :  { %619 = vmatmul.mubr.msk.f32.vlgmr.msra.gmra.mrb[2].mxu0 %vm385_vm10, %v384_v5  ;;  %477 = vmatpush1.msra.mxu1 %v380_v8 }
 0x350   :  { %620 = vmatmul.mubr.msk.f32.vlgmr.msra.gmra.mrb[2].mxu1 %vm385_vm10, %v384_v5 }
 0x422   :  { %v455_v29 = vpop.f32.mrb[2].mxu0 }
 0x423   :  { %v552_v14 = vmul.f32 %v535_v11, %v455_v29  ;;  %v457_v15 = vpop.f32.mrb[3].mxu0  ;;  %v526_v16 = vpop.f32.mrb[2].mxu1 }
 0x424   :  { %v553_v17 = vmul.f32 %v539_v12, %v457_v15  ;;  %v554_v18 = vmul.f32 %v543_v13, %v526_v16  ;;  %v528_v19 = vpop.f32.mrb[3].mxu1 }
 0x425   :  { %v555_v22 = vmul.f32 %v547_v20, %v528_v19 }
 0x426   :  { %v556_v21 = vadd.f32 %v553_v17, %v552_v14 }
 0x428   :  { %v557_v23 = vadd.f32 %v556_v21, %v554_v18 }
 0x42a   :  { %v558_v32 = vadd.f32 %v557_v23, %v555_v22 }
 0x42c   :  { %559 = vadd.xlane.f32.xlu1 %v558_v32 }
 0x43d   :  { %593 = vperm.xlu1 %755, %v888_v9  }
 0x4b9   :  { %v560_v24 = vpop.xlane.xlu1 %559 }
 0x4ba   :  { %v561_v34 = vmul.f32 0.0034722222, %v560_v24 }
 0x4bc   :  { %v562_v25 = vsub.f32 %v455_v29, %v561_v34  ;;  %v563_v26 = vsub.f32 %v457_v15, %v561_v34  ;;  %v564_v35 = vsub.f32 %v526_v16, %v561_v34  ;;  %v565_v27 = vsub.f32 %v528_v19, %v561_v34 }
 0x4bd   :  { %v594_v51 = vpop.permute.xlu1 %593 }
 0x4be   :  { %v566_v28 = vmul.f32 %v562_v25, %v535_v11  ;;  %v567_v33 = vmul.f32 %v563_v26, %v539_v12  ;;  %v568_v36 = vmul.f32 %v564_v35, %v543_v13  ;;  %v569_v37 = vmul.f32 %v565_v27, %v547_v20 }
 0x4c0   :  { %v570_v38 = vmul.f32 %v566_v28, %v566_v28  ;;  %v571_v40 = vmul.f32 %v567_v33, %v567_v33  ;;  %v572_v41 = vmul.f32 %v568_v36, %v568_v36  ;;  %v573_v39 = vmul.f32 %v569_v37, %v569_v37 }
 0x4c2   :  { %v574_v31 = vadd.f32 %v571_v40, %v570_v38 }
 0x4c4   :  { %v575_v42 = vadd.f32 %v574_v31, %v572_v41 }
 0x4c6   :  { %v576_v43 = vadd.f32 %v575_v42, %v573_v39 }
 0x4c8   :  { %577 = vadd.xlane.f32.xlu0 %v576_v43 }
 0x555   :  { %v578_v46 = vpop.xlane.xlu0 %577 }
 0x556   :  { %v579_v47 = vmul.f32 0.0034722222, %v578_v46 }
 0x558   :  { %v580_v48 = vadd.f32 1e-05, %v579_v47 }
 0x55a   :  { %759 = vrsqrt.f32 %v580_v48 }
 0x564   :  { %v760_v49 = vpop.eup %759 }
 0x565   :  { %v582_v50 = vmul.f32 %v760_v49, %v888_v9 }
 0x567   :  { %585 = vperm.xlu0 %754, %v582_v50  }
 0x56b   :  { %756 = vset.pattern.permute.xlu0 %v773_v45 }
 0x5e6   :  { %v586_v30 = vpop.permute.xlu0 %585 }
 0x5e7   :  { %v588_v52 = vmul.f32 %v586_v30, %v562_v25  ;;  %v589_v53 = vmul.f32 %v586_v30, %v563_v26  ;;  %v590_v54 = vmul.f32 %v586_v30, %v564_v35  ;;  %v591_v55 = vmul.f32 %v586_v30, %v565_v27 }
 0x5e9   :  { %v596_v56 = vadd.f32 %v594_v51, %v588_v52  ;;  %v597_v57 = vadd.f32 %v594_v51, %v589_v53  ;;  %v598_v58 = vadd.f32 %v594_v51, %v590_v54  ;;  %v599_v59 = vadd.f32 %v594_v51, %v591_v55 }
 0x5eb   :  { %v600_v60 = vmax.f32 %v596_v56, 0.0  ;;  %v601_v61 = vmax.f32 %v597_v57, 0.0  ;;  %v602_v62 = vmax.f32 %v598_v58, 0.0  ;;  %v603_v63 = vmax.f32 %v599_v59, 0.0 }
 0x5ed   :  { %604 = vst [vmem:[%s992_s5] sm:$0xff] %v600_v60  ;;  %605 = vst [vmem:[%s992_s5 + $0x8] sm:$0xff] %v601_v61 }
 0x5ee   :  { %606 = vst [vmem:[%s992_s5 + $0x10] sm:$0xff] %v602_v62  ;;  %607 = vst [vmem:[%s992_s5 + $0x18] sm:$0xff] %v603_v63 }

</bundles_post_ra>
